<compile_context>
chip_gen: v6e
topology: v6e:2x2x1
jax: 0.10.0
libtpu: 0.0.40
codegen_flags: <defaults>
</compile_context>

<pallas_src>
import functools
import math

import jax
import jax.numpy as jnp
from jax.experimental import pallas as pl
from jax.experimental.pallas import tpu as pltpu

_LANE = 128      # lane width of a vreg (last dim)
_SUBLANE = 8     # sublane count of a vreg (second-to-last dim)


def _pad_axis(a, axis, mult):
    """Zero-pad `a` along `axis` up to the next multiple of `mult`."""
    pad = (-a.shape[axis]) % mult
    if pad == 0:
        return a
    widths = [(0, 0)] * a.ndim
    widths[axis] = (0, pad)
    return jnp.pad(a, widths)


# ----------------------------- Pallas kernel ------------------------------ #
def _fused_mlp_kernel(x_ref, w1_ref, b1_ref, w2_ref, b2_ref, h_ref, y_ref):
    # Layer 1: h = relu(x @ W1 + b1).  W1 is already (In, Hidden): natural
    # K-major orientation for the MXU, hidden on the lane axis of the result.
    h = jnp.dot(x_ref[...], w1_ref[...], preferred_element_type=jnp.float32)
    h = jnp.maximum(h + b1_ref[...], 0.0)
    h_ref[...] = h.astype(h_ref.dtype)          # gathered layer-1 output

    # Layer 2 consumes the VMEM-resident value directly (no HBM round-trip).
    y = jnp.dot(h.astype(x_ref.dtype), w2_ref[...],
                preferred_element_type=jnp.float32)
    y_ref[...] = (y + b2_ref[...]).astype(y_ref.dtype)


# ------------------------------ Module forward ----------------------------- #
@functools.partial(jax.jit,
                   static_argnames=("hidden_size", "output_size", "world_size"))
def two_layer_mlp_forward(x, w1, b1, w2, b2, *,
                          hidden_size, output_size, world_size):
    """Mirrors TwoLayerMLP.forward: returns [partial1, out1, partial2, out2].

    w1: (world_size, hidden//ws, input)   b1: (world_size, hidden//ws)
    w2: (world_size, output//ws, hidden)  b2: (world_size, output//ws)
    """
    B, in_features = x.shape

    # Flatten the logical shards into full weights; the sharding here is purely
    # logical, and the concat of all shards' partials == the full linear layer.
    w1_full = w1.reshape(hidden_size, in_features).T        # (In, H)
    b1_full = b1.reshape(1, hidden_size)
    w2_full = w2.reshape(output_size, hidden_size).T        # (H, O)
    b2_full = b2.reshape(1, output_size)

    # Lane-dense padding: feature dims -> multiples of 128, batch -> mult of 8.
    xp  = _pad_axis(_pad_axis(x, 1, _LANE), 0, _SUBLANE)
    w1p = _pad_axis(_pad_axis(w1_full, 0, _LANE), 1, _LANE)
    w2p = _pad_axis(_pad_axis(w2_full, 0, _LANE), 1, _LANE)
    b1p = _pad_axis(b1_full, 1, _LANE)
    b2p = _pad_axis(b2_full, 1, _LANE)

    Bp, InP = xp.shape
    HP = w1p.shape[1]
    OP = w2p.shape[1]

    flops = 2 * Bp * (InP * HP + HP * OP)
    bytes_accessed = 4 * (xp.size + w1p.size + b1p.size + w2p.size + b2p.size
                          + Bp * HP + Bp * OP)

    h_pad, y_pad = pl.pallas_call(
        _fused_mlp_kernel,
        out_shape=(
            jax.ShapeDtypeStruct((Bp, HP), x.dtype),
            jax.ShapeDtypeStruct((Bp, OP), x.dtype),
        ),
        grid=(1,),
        in_specs=[
            pl.BlockSpec((Bp, InP), lambda i: (0, 0)),
            pl.BlockSpec((InP, HP), lambda i: (0, 0)),
            pl.BlockSpec((1, HP), lambda i: (0, 0)),
            pl.BlockSpec((HP, OP), lambda i: (0, 0)),
            pl.BlockSpec((1, OP), lambda i: (0, 0)),
        ],
        out_specs=(
            pl.BlockSpec((Bp, HP), lambda i: (0, 0)),
            pl.BlockSpec((Bp, OP), lambda i: (0, 0)),
        ),
        compiler_params=pltpu.CompilerParams(
            dimension_semantics=("arbitrary",),
        ),
        cost_estimate=pl.CostEstimate(
            flops=flops, transcendentals=0, bytes_accessed=bytes_accessed),
    )(xp, w1p, b1p, w2p, b2p)

    # Un-pad to the logical shapes.
    o1 = h_pad[:B, :hidden_size]     # all_gather'ed layer-1 output
    o2 = y_pad[:B, :output_size]     # all_gather'ed layer-2 output
    # Rank-0 "partial_output" of each ShardedLinear is just the first shard
    # slice of the gathered output — no separate kernel output needed.
    p1 = o1[:, : hidden_size // world_size]
    p2 = o2[:, : output_size // world_size]
    return [p1, o1, p2, o2]


# --------------------------- Parameter creation ---------------------------- #
def init_sharded_linear(key, in_features, out_features, world_size,
                        dtype=jnp.float32):
    """Matches nn.init.kaiming_uniform_(a=sqrt(5)) + uniform bias init.

    kaiming_uniform with a=sqrt(5) -> bound = 1/sqrt(fan_in); bias same bound.
    Weights stored per shard: (world_size, out_features//world_size, in_features).
    """
    out_shard = out_features // world_size
    kw, kb = jax.random.split(key)
    bound = 1.0 / math.sqrt(in_features)
    w = jax.random.uniform(kw, (world_size, out_shard, in_features),
                           dtype=dtype, minval=-bound, maxval=bound)
    b = jax.random.uniform(kb, (world_size, out_shard),
                           dtype=dtype, minval=-bound, maxval=bound)
    return w, b


# ----------------------------------- Main ----------------------------------- #
if __name__ == "__main__":
    batch, input_size, hidden_size, output_size, world_size = 8, 16, 32, 16, 2

    root = jax.random.PRNGKey(0)
    kx, k1, k2 = jax.random.split(root, 3)

    x = jax.random.normal(kx, (batch, input_size), dtype=jnp.float32)
    w1, b1 = init_sharded_linear(k1, input_size, hidden_size, world_size)
    w2, b2 = init_sharded_linear(k2, hidden_size, output_size, world_size)

    outs = two_layer_mlp_forward(
        x, w1, b1, w2, b2,
        hidden_size=hidden_size, output_size=output_size,
        world_size=world_size)
    outs = jax.block_until_ready(outs)

    # Reference check in plain JAX (full, unsharded math).
    w1_full = w1.reshape(hidden_size, input_size)
    b1_full = b1.reshape(hidden_size)
    w2_full = w2.reshape(output_size, hidden_size)
    b2_full = b2.reshape(output_size)
    h_ref = jnp.maximum(x @ w1_full.T + b1_full, 0.0)
    y_ref = h_ref @ w2_full.T + b2_full

    assert outs[0].shape == (batch, hidden_size // world_size)
    assert outs[1].shape == (batch, hidden_size)
    assert outs[2].shape == (batch, output_size // world_size)
    assert outs[3].shape == (batch, output_size)
    assert jnp.allclose(outs[1], h_ref, atol=1e-5, rtol=1e-5)
    assert jnp.allclose(outs[3], y_ref, atol=1e-5, rtol=1e-5)
    assert jnp.allclose(outs[0], h_ref[:, : hidden_size // world_size], atol=1e-5)
    assert jnp.allclose(outs[2], y_ref[:, : output_size // world_size], atol=1e-5)

    print("KERNEL_OK")
</pallas_src>

<mosaic_0001>
module attributes {stable_mosaic.version = 11 : i64} {
  func.func @_fused_mlp_kernel(%arg0: i32, %arg1: memref<8x128xf32, #tpu.memory_space<vmem>>, %arg2: memref<128x128xf32, #tpu.memory_space<vmem>>, %arg3: memref<1x128xf32, #tpu.memory_space<vmem>>, %arg4: memref<128x128xf32, #tpu.memory_space<vmem>>, %arg5: memref<1x128xf32, #tpu.memory_space<vmem>>, %arg6: memref<8x128xf32, #tpu.memory_space<vmem>>, %arg7: memref<8x128xf32, #tpu.memory_space<vmem>>) attributes {dimension_semantics = [#tpu.dimension_semantics<arbitrary>], iteration_bounds = array<i64: 1>, scalar_prefetch = 0 : i64, scratch_operands = 0 : i64, tpu.core_type = #tpu.core_type<tc>, window_params = [{pipeline_mode = #tpu.pipeline_mode<synchronous>, transform_indices = @transform_0, window_bounds = array<i64: 8, 128>}, {pipeline_mode = #tpu.pipeline_mode<synchronous>, transform_indices = @transform_1, window_bounds = array<i64: 128, 128>}, {pipeline_mode = #tpu.pipeline_mode<synchronous>, transform_indices = @transform_2, window_bounds = array<i64: 1, 128>}, {pipeline_mode = #tpu.pipeline_mode<synchronous>, transform_indices = @transform_3, window_bounds = array<i64: 128, 128>}, {pipeline_mode = #tpu.pipeline_mode<synchronous>, transform_indices = @transform_4, window_bounds = array<i64: 1, 128>}, {pipeline_mode = #tpu.pipeline_mode<synchronous>, transform_indices = @transform_5, window_bounds = array<i64: 8, 128>}, {pipeline_mode = #tpu.pipeline_mode<synchronous>, transform_indices = @transform_6, window_bounds = array<i64: 8, 128>}]} {
    %c0 = arith.constant 0 : index
    %c0_0 = arith.constant 0 : index
    %0 = vector.load %arg1[%c0, %c0_0] : memref<8x128xf32, #tpu.memory_space<vmem>>, vector<8x128xf32>
    %c0_1 = arith.constant 0 : index
    %c0_2 = arith.constant 0 : index
    %1 = vector.load %arg2[%c0_1, %c0_2] : memref<128x128xf32, #tpu.memory_space<vmem>>, vector<128x128xf32>
    %cst = arith.constant dense<0.000000e+00> : vector<8x128xf32>
    %2 = tpu.matmul %0, %1, %cst {dimension_numbers = #tpu.dot_dimension_numbers<[1], [0], [0], [1], [0, 0, 1, 1], [], []>} : vector<8x128xf32>, vector<128x128xf32>, vector<8x128xf32> -> vector<8x128xf32>
    %c0_3 = arith.constant 0 : index
    %c0_4 = arith.constant 0 : index
    %3 = vector.load %arg3[%c0_3, %c0_4] : memref<1x128xf32, #tpu.memory_space<vmem>>, vector<1x128xf32>
    %4 = vector.broadcast %3 : vector<1x128xf32> to vector<8x128xf32>
    %5 = arith.addf %2, %4 : vector<8x128xf32>
    %cst_5 = arith.constant 0.000000e+00 : f32
    %6 = vector.broadcast %cst_5 : f32 to vector<8x128xf32>
    %7 = arith.maximumf %5, %6 : vector<8x128xf32>
    %c0_6 = arith.constant 0 : index
    %c0_7 = arith.constant 0 : index
    %8 = vector.load %arg6[%c0_6, %c0_7] : memref<8x128xf32, #tpu.memory_space<vmem>>, vector<8x128xf32>
    tpu.vector_store %arg6[%c0_6, %c0_7], %7 {strides = array<i32>} : memref<8x128xf32, #tpu.memory_space<vmem>>, vector<8x128xf32>,
    %c0_8 = arith.constant 0 : index
    %c0_9 = arith.constant 0 : index
    %9 = vector.load %arg4[%c0_8, %c0_9] : memref<128x128xf32, #tpu.memory_space<vmem>>, vector<128x128xf32>
    %cst_10 = arith.constant dense<0.000000e+00> : vector<8x128xf32>
    %10 = tpu.matmul %7, %9, %cst_10 {dimension_numbers = #tpu.dot_dimension_numbers<[1], [0], [0], [1], [0, 0, 1, 1], [], []>} : vector<8x128xf32>, vector<128x128xf32>, vector<8x128xf32> -> vector<8x128xf32>
    %c0_11 = arith.constant 0 : index
    %c0_12 = arith.constant 0 : index
    %11 = vector.load %arg5[%c0_11, %c0_12] : memref<1x128xf32, #tpu.memory_space<vmem>>, vector<1x128xf32>
    %12 = vector.broadcast %11 : vector<1x128xf32> to vector<8x128xf32>
    %13 = arith.addf %10, %12 : vector<8x128xf32>
    %c0_13 = arith.constant 0 : index
    %c0_14 = arith.constant 0 : index
    %14 = vector.load %arg7[%c0_13, %c0_14] : memref<8x128xf32, #tpu.memory_space<vmem>>, vector<8x128xf32>
    tpu.vector_store %arg7[%c0_13, %c0_14], %13 {strides = array<i32>} : memref<8x128xf32, #tpu.memory_space<vmem>>, vector<8x128xf32>,
    return
  }
  func.func @transform_0(%arg0: i32) -> (i32, i32) {
    %c0_i32 = arith.constant 0 : i32
    %c0_i32_0 = arith.constant 0 : i32
    %c0_i32_1 = arith.constant 0 : i32
    return %c0_i32, %c0_i32_0 : i32, i32
  }
  func.func @transform_1(%arg0: i32) -> (i32, i32) {
    %c0_i32 = arith.constant 0 : i32
    %c0_i32_0 = arith.constant 0 : i32
    %c0_i32_1 = arith.constant 0 : i32
    return %c0_i32, %c0_i32_0 : i32, i32
  }
  func.func @transform_2(%arg0: i32) -> (i32, i32) {
    %c0_i32 = arith.constant 0 : i32
    %c0_i32_0 = arith.constant 0 : i32
    %c0_i32_1 = arith.constant 0 : i32
    return %c0_i32, %c0_i32_0 : i32, i32
  }
  func.func @transform_3(%arg0: i32) -> (i32, i32) {
    %c0_i32 = arith.constant 0 : i32
    %c0_i32_0 = arith.constant 0 : i32
    %c0_i32_1 = arith.constant 0 : i32
    return %c0_i32, %c0_i32_0 : i32, i32
  }
  func.func @transform_4(%arg0: i32) -> (i32, i32) {
    %c0_i32 = arith.constant 0 : i32
    %c0_i32_0 = arith.constant 0 : i32
    %c0_i32_1 = arith.constant 0 : i32
    return %c0_i32, %c0_i32_0 : i32, i32
  }
  func.func @transform_5(%arg0: i32) -> (i32, i32) {
    %c0_i32 = arith.constant 0 : i32
    %c0_i32_0 = arith.constant 0 : i32
    %c0_i32_1 = arith.constant 0 : i32
    return %c0_i32, %c0_i32_0 : i32, i32
  }
  func.func @transform_6(%arg0: i32) -> (i32, i32) {
    %c0_i32 = arith.constant 0 : i32
    %c0_i32_0 = arith.constant 0 : i32
    %c0_i32_1 = arith.constant 0 : i32
    return %c0_i32, %c0_i32_0 : i32, i32
  }
}

</mosaic_0001>

<bundles_post_ra>
// kernel: two_layer_mlp_forward.1
= control target key start
LH: loop header
LB: loop body
LE: loop exit
PB: predicated region body
PF: predicated region fallthrough
CT: control target
= control target key end

     0   :  { %v328_v0 = vmov 0.0   ;;  %vm329_vm0 = vmmov 0   ;;  %s510_s1 = inlined_call_operand.vmem [shape: f32[128,128], index: 1, kind: input, shape index: {}]   ;;  %s511_s3 = inlined_call_operand.vmem [shape: f32[128,128], index: 3, kind: input, shape index: {}]   ;;  %s512_s0 = inlined_call_operand.vmem [shape: f32[8,128], index: 0, kind: input, shape index: {}]   ;;  %s513_s2 = inlined_call_operand.vmem [shape: f32[1,128], index: 2, kind: input, shape index: {}]   ;;  %s514_s5 = inlined_call_operand.vmem [shape: f32[8,128], index: 5, kind: output, shape index: {0}]   ;;  %s515_s4 = inlined_call_operand.vmem [shape: f32[1,128], index: 4, kind: input, shape index: {}]   ;;  %s516_s6 = inlined_call_operand.vmem [shape: f32[8,128], index: 6, kind: output, shape index: {1}]  }
   0x1   :  { %256 = vmatprep.subr.mxu0 %v328_v0  ;;  %v38_v1 = vld [vmem:[%s510_s1 + $0x78] sm:$0xff]  ;;  %v37_v2 = vld [vmem:[%s510_s1 + $0x70] sm:$0xff]  ;;  %288 = vmatprep.mubr.msk.f32.mxu0 %vm329_vm0, %v328_v0  ;;  %v36_v3 = vld [vmem:[%s510_s1 + $0x68] sm:$0xff] }
   0x2   :  { %257 = vmatpush3.msra.mxu0 %v38_v1  ;;  %291 = vmatprep.subr.mxu1 %v328_v0  ;;  %v35_v4 = vld [vmem:[%s510_s1 + $0x60] sm:$0xff]  ;;  %v133_v5 = vld [vmem:[%s511_s3 + $0x78] sm:$0xff]  ;;  %v132_v7 = vld [vmem:[%s511_s3 + $0x70] sm:$0xff] }
   0x3   :  { %258 = vmatprep.subr.mxu0 %v328_v0  ;;  %323 = vmatprep.mubr.msk.f32.mxu1 %vm329_vm0, %v328_v0  ;;  %v34_v6 = vld [vmem:[%s510_s1 + $0x58] sm:$0xff]  ;;  %v131_v8 = vld [vmem:[%s511_s3 + $0x68] sm:$0xff]  ;;  %v33_v9 = vld [vmem:[%s510_s1 + $0x50] sm:$0xff] }
   0x4   :  { %259 = vmatpush3.msra.mxu0 %v37_v2  ;;  %292 = vmatpush3.msra.mxu1 %v133_v5  ;;  %v130_v10 = vld [vmem:[%s511_s3 + $0x60] sm:$0xff]  ;;  %v32_v11 = vld [vmem:[%s510_s1 + $0x48] sm:$0xff]  ;;  %v129_v12 = vld [vmem:[%s511_s3 + $0x58] sm:$0xff] }
   0x5   :  { %260 = vmatprep.subr.mxu0 %v328_v0  ;;  %293 = vmatprep.subr.mxu1 %v328_v0  ;;  %v31_v13 = vld [vmem:[%s510_s1 + $0x40] sm:$0xff]  ;;  %v128_v14 = vld [vmem:[%s511_s3 + $0x50] sm:$0xff]  ;;  %v30_v15 = vld [vmem:[%s510_s1 + $0x38] sm:$0xff] }
   0x6   :  { %261 = vmatpush3.msra.mxu0 %v36_v3  ;;  %294 = vmatpush3.msra.mxu1 %v132_v7  ;;  %v127_v16 = vld [vmem:[%s511_s3 + $0x48] sm:$0xff]  ;;  %v29_v17 = vld [vmem:[%s510_s1 + $0x30] sm:$0xff]  ;;  %v126_v18 = vld [vmem:[%s511_s3 + $0x40] sm:$0xff] }
   0x7   :  { %262 = vmatprep.subr.mxu0 %v328_v0  ;;  %295 = vmatprep.subr.mxu1 %v328_v0  ;;  %v28_v19 = vld [vmem:[%s510_s1 + $0x28] sm:$0xff]  ;;  %v125_v20 = vld [vmem:[%s511_s3 + $0x38] sm:$0xff]  ;;  %v27_v21 = vld [vmem:[%s510_s1 + $0x20] sm:$0xff] }
   0x8   :  { %263 = vmatpush3.msra.mxu0 %v35_v4  ;;  %296 = vmatpush3.msra.mxu1 %v131_v8  ;;  %v124_v22 = vld [vmem:[%s511_s3 + $0x30] sm:$0xff]  ;;  %v26_v23 = vld [vmem:[%s510_s1 + $0x18] sm:$0xff]  ;;  %v123_v24 = vld [vmem:[%s511_s3 + $0x28] sm:$0xff] }
   0x9   :  { %264 = vmatprep.subr.mxu0 %v328_v0  ;;  %297 = vmatprep.subr.mxu1 %v328_v0  ;;  %v25_v25 = vld [vmem:[%s510_s1 + $0x10] sm:$0xff]  ;;  %v122_v26 = vld [vmem:[%s511_s3 + $0x20] sm:$0xff]  ;;  %v24_v27 = vld [vmem:[%s510_s1 + $0x8] sm:$0xff] }
   0xa   :  { %265 = vmatpush3.msra.mxu0 %v34_v6  ;;  %298 = vmatpush3.msra.mxu1 %v130_v10  ;;  %v121_v28 = vld [vmem:[%s511_s3 + $0x18] sm:$0xff]  ;;  %v23_v29 = vld [vmem:[%s510_s1] sm:$0xff]  ;;  %v120_v31 = vld [vmem:[%s511_s3 + $0x10] sm:$0xff] }
   0xb   :  { %266 = vmatprep.subr.mxu0 %v328_v0  ;;  %299 = vmatprep.subr.mxu1 %v328_v0  ;;  %v22_v30 = vld [vmem:[%s512_s0] sm:$0xff]  ;;  %v119_v32 = vld [vmem:[%s511_s3 + $0x8] sm:$0xff] }
   0xc   :  { %267 = vmatpush3.msra.mxu0 %v33_v9  ;;  %300 = vmatpush3.msra.mxu1 %v129_v12  ;;  %v118_v33 = vld [vmem:[%s511_s3] sm:$0xff] }
   0xd   :  { %268 = vmatprep.subr.mxu0 %v328_v0  ;;  %301 = vmatprep.subr.mxu1 %v328_v0  ;;  %v220_v34 = vld [vmem:[%s513_s2] ss:$0 sm:$0xff] }
   0xe   :  { %269 = vmatpush3.msra.mxu0 %v32_v11  ;;  %302 = vmatpush3.msra.mxu1 %v128_v14  ;;  %v221_v39 = vld [vmem:[%s515_s4] ss:$0 sm:$0xff] }
   0xf   :  { %270 = vmatprep.subr.mxu0 %v328_v0  ;;  %303 = vmatprep.subr.mxu1 %v328_v0 }
  0x10   :  { %271 = vmatpush3.msra.mxu0 %v31_v13  ;;  %304 = vmatpush3.msra.mxu1 %v127_v16 }
  0x11   :  { %272 = vmatprep.subr.mxu0 %v328_v0  ;;  %305 = vmatprep.subr.mxu1 %v328_v0 }
  0x12   :  { %273 = vmatpush3.msra.mxu0 %v30_v15  ;;  %306 = vmatpush3.msra.mxu1 %v126_v18 }
  0x13   :  { %274 = vmatprep.subr.mxu0 %v328_v0  ;;  %307 = vmatprep.subr.mxu1 %v328_v0 }
  0x14   :  { %275 = vmatpush3.msra.mxu0 %v29_v17  ;;  %308 = vmatpush3.msra.mxu1 %v125_v20 }
  0x15   :  { %276 = vmatprep.subr.mxu0 %v328_v0  ;;  %309 = vmatprep.subr.mxu1 %v328_v0 }
  0x16   :  { %277 = vmatpush3.msra.mxu0 %v28_v19  ;;  %310 = vmatpush3.msra.mxu1 %v124_v22 }
  0x17   :  { %278 = vmatprep.subr.mxu0 %v328_v0  ;;  %311 = vmatprep.subr.mxu1 %v328_v0 }
  0x18   :  { %279 = vmatpush3.msra.mxu0 %v27_v21  ;;  %312 = vmatpush3.msra.mxu1 %v123_v24 }
  0x19   :  { %280 = vmatprep.subr.mxu0 %v328_v0  ;;  %313 = vmatprep.subr.mxu1 %v328_v0 }
  0x1a   :  { %281 = vmatpush3.msra.mxu0 %v26_v23  ;;  %314 = vmatpush3.msra.mxu1 %v122_v26 }
  0x1b   :  { %282 = vmatprep.subr.mxu0 %v328_v0  ;;  %315 = vmatprep.subr.mxu1 %v328_v0 }
  0x1c   :  { %283 = vmatpush3.msra.mxu0 %v25_v25  ;;  %316 = vmatpush3.msra.mxu1 %v121_v28 }
  0x1d   :  { %284 = vmatprep.subr.mxu0 %v328_v0  ;;  %317 = vmatprep.subr.mxu1 %v328_v0 }
  0x1e   :  { %285 = vmatpush3.msra.mxu0 %v24_v27  ;;  %318 = vmatpush3.msra.mxu1 %v120_v31 }
  0x1f   :  { %286 = vmatprep.subr.mxu0 %v328_v0  ;;  %319 = vmatprep.subr.mxu1 %v328_v0 }
  0x20   :  { %287 = vmatpush3.msra.mxu0 %v23_v29  ;;  %320 = vmatpush3.msra.mxu1 %v119_v32 }
  0x21   :  { %289 = vmatmul.mubr.f32.vlgmr.msra.gmra.mxu0 %v22_v30  ;;  %321 = vmatprep.subr.mxu1 %v328_v0 }
  0x22   :  { %322 = vmatpush3.msra.mxu1 %v118_v33 }
  0xe1   :  { %v112_v35 = vpop.f32.mrf.mxu0 }
  0xe2   :  { %v113_v36 = vadd.f32 %v220_v34, %v112_v35 }
  0xe3   :  { %v290_v37 = vpop.f32.mrf.mxu0 }
  0xe4   :  { %v116_v38 = vmax.f32 %v113_v36, 0.0 }
  0xe6   :  { %117 = vst [vmem:[%s514_s5] sm:$0xff] %v116_v38  ;;  %324 = vmatmul.mubr.f32.vlgmr.msra.gmra.mxu1 %v116_v38 }
 0x1a6   :  { %v207_v40 = vpop.f32.mrf.mxu1 }
 0x1a7   :  { %v208_v41 = vadd.f32 %v221_v39, %v207_v40 }
 0x1a8   :  { %v325_v42 = vpop.f32.mrf.mxu1 }
 0x1a9   :  { %211 = vst [vmem:[%s516_s6] sm:$0xff] %v208_v41 }

</bundles_post_ra>
